<compile_context>
chip_gen: v7x
topology: tpu7x:2x2x1
jax: 0.10.0
libtpu: 0.0.40
codegen_flags: <defaults>
</compile_context>

<pallas_src>
import jax
import jax.numpy as jnp
from jax import lax
from jax.experimental import pallas as pl
from jax.experimental.pallas import tpu as pltpu


def lstm_tagger_kernel(idx_ref, emb_ref, wih_ref, whh_ref, b_ref, out_ref):
    """Fused kernel: in-kernel embedding gather, one batched input-projection matmul,
    and a fully unrolled recurrence with h/c carried in vector registers.

    idx_ref : (S,)    int32 word indices             (SMEM)
    emb_ref : (V, E)  embedding table                (VMEM)
    wih_ref : (E, 4H) input->gates weights  (W_ih^T) (VMEM)
    whh_ref : (H, 4H) hidden->gates weights (W_hh^T) (VMEM)
    b_ref   : (1, 4H) bias_ih + bias_hh              (VMEM)
    out_ref : (S, H)  per-timestep hidden states     (VMEM)
    """
    S, H = out_ref.shape

    # In-kernel embedding gather: S is tiny & static -> unrolled dynamic row loads.
    rows = [emb_ref[pl.ds(idx_ref[t], 1), :] for t in range(S)]
    x = jnp.concatenate(rows, axis=0)                            # (S, E)

    # Hoist all weight/bias loads out of the recurrence (stay resident in vregs).
    wih = wih_ref[...]
    whh = whh_ref[...]
    b = b_ref[...]

    # Input projection for ALL timesteps in one MXU matmul, plus bias.   (S, 4H)
    xg = jnp.dot(x, wih, preferred_element_type=jnp.float32) + b

    # h_0 = c_0 = 0 (matches LSTMTagger.init_hidden); carried in registers.
    h = jnp.zeros((1, H), dtype=jnp.float32)
    c = jnp.zeros((1, H), dtype=jnp.float32)

    # Fully unrolled serial recurrence (S static).  PyTorch gate order [i|f|g|o].
    hs = []
    for t in range(S):
        g = xg[t:t + 1, :] + jnp.dot(h, whh, preferred_element_type=jnp.float32)
        # Full-vector transcendentals: one sigmoid + one tanh push per step,
        # then slice the gates out of the results.
        sg = jax.nn.sigmoid(g)
        tg = jnp.tanh(g)
        i = sg[:, 0 * H:1 * H]
        f = sg[:, 1 * H:2 * H]
        gg = tg[:, 2 * H:3 * H]
        o = sg[:, 3 * H:4 * H]
        c = f * c + i * gg
        h = o * jnp.tanh(c)
        hs.append(h)

    # Single bulk store of all timesteps (no per-step masked partial stores).
    out_ref[...] = jnp.concatenate(hs, axis=0)


def pack_params(params):
    """One-time parameter packing (kept off the per-call path)."""
    return {
        "embedding": params["embedding"],                              # (V, E)
        "wih_t": jnp.transpose(params["weight_ih_l0"]),                # (E, 4H)
        "whh_t": jnp.transpose(params["weight_hh_l0"]),                # (H, 4H)
        "bias": (params["bias_ih_l0"] + params["bias_hh_l0"]).reshape(1, -1),  # (1, 4H)
    }


def lstm_tagger_forward(word_idxs, packed):
    """Wrapper: single pallas_call doing gather + LSTM; dropout (eval) is identity."""
    emb_table = packed["embedding"]
    wih_t = packed["wih_t"]
    whh_t = packed["whh_t"]
    b2d = packed["bias"]

    S = word_idxs.shape[0]
    H = whh_t.shape[0]

    vmem = pl.BlockSpec(memory_space=pltpu.MemorySpace.VMEM)
    smem = pl.BlockSpec(memory_space=pltpu.MemorySpace.SMEM)

    lstm_out = pl.pallas_call(
        lstm_tagger_kernel,
        out_shape=jax.ShapeDtypeStruct((S, H), jnp.float32),
        in_specs=[smem, vmem, vmem, vmem, vmem],
        out_specs=vmem,
    )(word_idxs.astype(jnp.int32), emb_table, wih_t, whh_t, b2d)

    # dropout in eval mode == identity
    return lstm_out.reshape(S, 1, H)          # (seq_len, 1, hidden_dim)


def _reference_forward(word_idxs, params):
    """Plain-JAX reference for correctness check."""
    emb = params["embedding"][word_idxs]
    w_ih = params["weight_ih_l0"]
    w_hh = params["weight_hh_l0"]
    b = params["bias_ih_l0"] + params["bias_hh_l0"]
    H = w_hh.shape[1]

    def step(carry, x_t):
        h, c = carry
        g = x_t @ w_ih.T + h @ w_hh.T + b
        i = jax.nn.sigmoid(g[0 * H:1 * H])
        f = jax.nn.sigmoid(g[1 * H:2 * H])
        gg = jnp.tanh(g[2 * H:3 * H])
        o = jax.nn.sigmoid(g[3 * H:4 * H])
        c = f * c + i * gg
        h = o * jnp.tanh(c)
        return (h, c), h

    h0 = jnp.zeros((H,), jnp.float32)
    (_, _), hs = lax.scan(step, (h0, h0), emb)
    return hs.reshape(emb.shape[0], 1, H)


if __name__ == "__main__":
    # Module hyperparameters (small, deterministic).
    vocab_size = 50
    embedding_dim = 32
    hidden_dim = 32
    seq_len = 8

    key = jax.random.PRNGKey(0)
    k0, k1, k2, k3, k4, k5 = jax.random.split(key, 6)

    params = {
        "embedding": jax.random.normal(k0, (vocab_size, embedding_dim), jnp.float32) * 0.1,
        "weight_ih_l0": jax.random.normal(k1, (4 * hidden_dim, embedding_dim), jnp.float32) * 0.1,
        "weight_hh_l0": jax.random.normal(k2, (4 * hidden_dim, hidden_dim), jnp.float32) * 0.1,
        "bias_ih_l0": jax.random.normal(k3, (4 * hidden_dim,), jnp.float32) * 0.1,
        "bias_hh_l0": jax.random.normal(k4, (4 * hidden_dim,), jnp.float32) * 0.1,
    }

    # "sentence" = list of (word_idx,) — just word indices since pos_vector_size=0.
    word_idxs = jax.random.randint(k5, (seq_len,), 0, vocab_size)

    packed = pack_params(params)
    out = lstm_tagger_forward(word_idxs, packed)
    out = jax.block_until_ready(out)

    ref = _reference_forward(word_idxs, params)
    assert out.shape == (seq_len, 1, hidden_dim)
    assert jnp.allclose(out, ref, atol=1e-5, rtol=1e-5), "mismatch vs reference"

    print("KERNEL_OK")
</pallas_src>

<mosaic_0001>
module attributes {stable_mosaic.version = 11 : i64} {
  func.func @lstm_tagger_kernel(%arg0: memref<8xi32, #tpu.memory_space<smem>>, %arg1: memref<50x32xf32, #tpu.memory_space<vmem>>, %arg2: memref<32x128xf32, #tpu.memory_space<vmem>>, %arg3: memref<32x128xf32, #tpu.memory_space<vmem>>, %arg4: memref<1x128xf32, #tpu.memory_space<vmem>>, %arg5: memref<8x32xf32, #tpu.memory_space<vmem>>) attributes {dimension_semantics = [], scalar_prefetch = 0 : i64, scratch_operands = 0 : i64, tpu.core_type = #tpu.core_type<tc>} {
    %c0 = arith.constant 0 : index
    %0 = memref.load %arg0[%c0] : memref<8xi32, #tpu.memory_space<smem>>
    %1 = arith.index_cast %0 : i32 to index
    %c0_0 = arith.constant 0 : index
    %2 = vector.load %arg1[%1, %c0_0] : memref<50x32xf32, #tpu.memory_space<vmem>>, vector<1x32xf32>
    %c1 = arith.constant 1 : index
    %3 = memref.load %arg0[%c1] : memref<8xi32, #tpu.memory_space<smem>>
    %4 = arith.index_cast %3 : i32 to index
    %c0_1 = arith.constant 0 : index
    %5 = vector.load %arg1[%4, %c0_1] : memref<50x32xf32, #tpu.memory_space<vmem>>, vector<1x32xf32>
    %c2 = arith.constant 2 : index
    %6 = memref.load %arg0[%c2] : memref<8xi32, #tpu.memory_space<smem>>
    %7 = arith.index_cast %6 : i32 to index
    %c0_2 = arith.constant 0 : index
    %8 = vector.load %arg1[%7, %c0_2] : memref<50x32xf32, #tpu.memory_space<vmem>>, vector<1x32xf32>
    %c3 = arith.constant 3 : index
    %9 = memref.load %arg0[%c3] : memref<8xi32, #tpu.memory_space<smem>>
    %10 = arith.index_cast %9 : i32 to index
    %c0_3 = arith.constant 0 : index
    %11 = vector.load %arg1[%10, %c0_3] : memref<50x32xf32, #tpu.memory_space<vmem>>, vector<1x32xf32>
    %c4 = arith.constant 4 : index
    %12 = memref.load %arg0[%c4] : memref<8xi32, #tpu.memory_space<smem>>
    %13 = arith.index_cast %12 : i32 to index
    %c0_4 = arith.constant 0 : index
    %14 = vector.load %arg1[%13, %c0_4] : memref<50x32xf32, #tpu.memory_space<vmem>>, vector<1x32xf32>
    %c5 = arith.constant 5 : index
    %15 = memref.load %arg0[%c5] : memref<8xi32, #tpu.memory_space<smem>>
    %16 = arith.index_cast %15 : i32 to index
    %c0_5 = arith.constant 0 : index
    %17 = vector.load %arg1[%16, %c0_5] : memref<50x32xf32, #tpu.memory_space<vmem>>, vector<1x32xf32>
    %c6 = arith.constant 6 : index
    %18 = memref.load %arg0[%c6] : memref<8xi32, #tpu.memory_space<smem>>
    %19 = arith.index_cast %18 : i32 to index
    %c0_6 = arith.constant 0 : index
    %20 = vector.load %arg1[%19, %c0_6] : memref<50x32xf32, #tpu.memory_space<vmem>>, vector<1x32xf32>
    %c7 = arith.constant 7 : index
    %21 = memref.load %arg0[%c7] : memref<8xi32, #tpu.memory_space<smem>>
    %22 = arith.index_cast %21 : i32 to index
    %c0_7 = arith.constant 0 : index
    %23 = vector.load %arg1[%22, %c0_7] : memref<50x32xf32, #tpu.memory_space<vmem>>, vector<1x32xf32>
    %24 = tpu.concatenate %2, %5, %8, %11, %14, %17, %20, %23 in 0 : vector<1x32xf32>, vector<1x32xf32>, vector<1x32xf32>, vector<1x32xf32>, vector<1x32xf32>, vector<1x32xf32>, vector<1x32xf32>, vector<1x32xf32> -> vector<8x32xf32>
    %c0_8 = arith.constant 0 : index
    %c0_9 = arith.constant 0 : index
    %25 = vector.load %arg2[%c0_8, %c0_9] : memref<32x128xf32, #tpu.memory_space<vmem>>, vector<32x128xf32>
    %c0_10 = arith.constant 0 : index
    %c0_11 = arith.constant 0 : index
    %26 = vector.load %arg3[%c0_10, %c0_11] : memref<32x128xf32, #tpu.memory_space<vmem>>, vector<32x128xf32>
    %c0_12 = arith.constant 0 : index
    %c0_13 = arith.constant 0 : index
    %27 = vector.load %arg4[%c0_12, %c0_13] : memref<1x128xf32, #tpu.memory_space<vmem>>, vector<1x128xf32>
    %cst = arith.constant dense<0.000000e+00> : vector<8x128xf32>
    %28 = tpu.matmul %24, %25, %cst {dimension_numbers = #tpu.dot_dimension_numbers<[1], [0], [0], [1], [0, 0, 1, 1], [], []>} : vector<8x32xf32>, vector<32x128xf32>, vector<8x128xf32> -> vector<8x128xf32>
    %29 = vector.broadcast %27 : vector<1x128xf32> to vector<8x128xf32>
    %30 = arith.addf %28, %29 : vector<8x128xf32>
    %cst_14 = arith.constant 0.000000e+00 : f32
    %31 = vector.broadcast %cst_14 : f32 to vector<1x32xf32>
    %cst_15 = arith.constant 0.000000e+00 : f32
    %32 = vector.broadcast %cst_15 : f32 to vector<1x32xf32>
    %33 = vector.extract_strided_slice %30 {offsets = [0, 0], sizes = [1, 128], strides = [1, 1]} : vector<8x128xf32> to vector<1x128xf32>
    %cst_16 = arith.constant dense<0.000000e+00> : vector<1x128xf32>
    %34 = tpu.matmul %31, %26, %cst_16 {dimension_numbers = #tpu.dot_dimension_numbers<[1], [0], [0], [1], [0, 0, 1, 1], [], []>} : vector<1x32xf32>, vector<32x128xf32>, vector<1x128xf32> -> vector<1x128xf32>
    %35 = arith.addf %33, %34 : vector<1x128xf32>
    %36 = arith.negf %35 : vector<1x128xf32>
    %37 = math.exp %36 : vector<1x128xf32>
    %cst_17 = arith.constant 1.000000e+00 : f32
    %38 = vector.broadcast %cst_17 : f32 to vector<1x128xf32>
    %39 = arith.addf %38, %37 : vector<1x128xf32>
    %40 = arith.divf %38, %39 : vector<1x128xf32>
    %41 = math.tanh %35 : vector<1x128xf32>
    %42 = vector.extract_strided_slice %40 {offsets = [0, 0], sizes = [1, 32], strides = [1, 1]} : vector<1x128xf32> to vector<1x32xf32>
    %43 = vector.extract_strided_slice %40 {offsets = [0, 32], sizes = [1, 32], strides = [1, 1]} : vector<1x128xf32> to vector<1x32xf32>
    %44 = vector.extract_strided_slice %41 {offsets = [0, 64], sizes = [1, 32], strides = [1, 1]} : vector<1x128xf32> to vector<1x32xf32>
    %45 = vector.extract_strided_slice %40 {offsets = [0, 96], sizes = [1, 32], strides = [1, 1]} : vector<1x128xf32> to vector<1x32xf32>
    %46 = arith.mulf %43, %32 : vector<1x32xf32>
    %47 = arith.mulf %42, %44 : vector<1x32xf32>
    %48 = arith.addf %46, %47 : vector<1x32xf32>
    %49 = math.tanh %48 : vector<1x32xf32>
    %50 = arith.mulf %45, %49 : vector<1x32xf32>
    %51 = vector.extract_strided_slice %30 {offsets = [1, 0], sizes = [1, 128], strides = [1, 1]} : vector<8x128xf32> to vector<1x128xf32>
    %cst_18 = arith.constant dense<0.000000e+00> : vector<1x128xf32>
    %52 = tpu.matmul %50, %26, %cst_18 {dimension_numbers = #tpu.dot_dimension_numbers<[1], [0], [0], [1], [0, 0, 1, 1], [], []>} : vector<1x32xf32>, vector<32x128xf32>, vector<1x128xf32> -> vector<1x128xf32>
    %53 = arith.addf %51, %52 : vector<1x128xf32>
    %54 = arith.negf %53 : vector<1x128xf32>
    %55 = math.exp %54 : vector<1x128xf32>
    %cst_19 = arith.constant 1.000000e+00 : f32
    %56 = vector.broadcast %cst_19 : f32 to vector<1x128xf32>
    %57 = arith.addf %56, %55 : vector<1x128xf32>
    %58 = arith.divf %56, %57 : vector<1x128xf32>
    %59 = math.tanh %53 : vector<1x128xf32>
    %60 = vector.extract_strided_slice %58 {offsets = [0, 0], sizes = [1, 32], strides = [1, 1]} : vector<1x128xf32> to vector<1x32xf32>
    %61 = vector.extract_strided_slice %58 {offsets = [0, 32], sizes = [1, 32], strides = [1, 1]} : vector<1x128xf32> to vector<1x32xf32>
    %62 = vector.extract_strided_slice %59 {offsets = [0, 64], sizes = [1, 32], strides = [1, 1]} : vector<1x128xf32> to vector<1x32xf32>
    %63 = vector.extract_strided_slice %58 {offsets = [0, 96], sizes = [1, 32], strides = [1, 1]} : vector<1x128xf32> to vector<1x32xf32>
    %64 = arith.mulf %61, %48 : vector<1x32xf32>
    %65 = arith.mulf %60, %62 : vector<1x32xf32>
    %66 = arith.addf %64, %65 : vector<1x32xf32>
    %67 = math.tanh %66 : vector<1x32xf32>
    %68 = arith.mulf %63, %67 : vector<1x32xf32>
    %69 = vector.extract_strided_slice %30 {offsets = [2, 0], sizes = [1, 128], strides = [1, 1]} : vector<8x128xf32> to vector<1x128xf32>
    %cst_20 = arith.constant dense<0.000000e+00> : vector<1x128xf32>
    %70 = tpu.matmul %68, %26, %cst_20 {dimension_numbers = #tpu.dot_dimension_numbers<[1], [0], [0], [1], [0, 0, 1, 1], [], []>} : vector<1x32xf32>, vector<32x128xf32>, vector<1x128xf32> -> vector<1x128xf32>
    %71 = arith.addf %69, %70 : vector<1x128xf32>
    %72 = arith.negf %71 : vector<1x128xf32>
    %73 = math.exp %72 : vector<1x128xf32>
    %cst_21 = arith.constant 1.000000e+00 : f32
    %74 = vector.broadcast %cst_21 : f32 to vector<1x128xf32>
    %75 = arith.addf %74, %73 : vector<1x128xf32>
    %76 = arith.divf %74, %75 : vector<1x128xf32>
    %77 = math.tanh %71 : vector<1x128xf32>
    %78 = vector.extract_strided_slice %76 {offsets = [0, 0], sizes = [1, 32], strides = [1, 1]} : vector<1x128xf32> to vector<1x32xf32>
    %79 = vector.extract_strided_slice %76 {offsets = [0, 32], sizes = [1, 32], strides = [1, 1]} : vector<1x128xf32> to vector<1x32xf32>
    %80 = vector.extract_strided_slice %77 {offsets = [0, 64], sizes = [1, 32], strides = [1, 1]} : vector<1x128xf32> to vector<1x32xf32>
    %81 = vector.extract_strided_slice %76 {offsets = [0, 96], sizes = [1, 32], strides = [1, 1]} : vector<1x128xf32> to vector<1x32xf32>
    %82 = arith.mulf %79, %66 : vector<1x32xf32>
    %83 = arith.mulf %78, %80 : vector<1x32xf32>
    %84 = arith.addf %82, %83 : vector<1x32xf32>
    %85 = math.tanh %84 : vector<1x32xf32>
    %86 = arith.mulf %81, %85 : vector<1x32xf32>
    %87 = vector.extract_strided_slice %30 {offsets = [3, 0], sizes = [1, 128], strides = [1, 1]} : vector<8x128xf32> to vector<1x128xf32>
    %cst_22 = arith.constant dense<0.000000e+00> : vector<1x128xf32>
    %88 = tpu.matmul %86, %26, %cst_22 {dimension_numbers = #tpu.dot_dimension_numbers<[1], [0], [0], [1], [0, 0, 1, 1], [], []>} : vector<1x32xf32>, vector<32x128xf32>, vector<1x128xf32> -> vector<1x128xf32>
    %89 = arith.addf %87, %88 : vector<1x128xf32>
    %90 = arith.negf %89 : vector<1x128xf32>
    %91 = math.exp %90 : vector<1x128xf32>
    %cst_23 = arith.constant 1.000000e+00 : f32
    %92 = vector.broadcast %cst_23 : f32 to vector<1x128xf32>
    %93 = arith.addf %92, %91 : vector<1x128xf32>
    %94 = arith.divf %92, %93 : vector<1x128xf32>
    %95 = math.tanh %89 : vector<1x128xf32>
    %96 = vector.extract_strided_slice %94 {offsets = [0, 0], sizes = [1, 32], strides = [1, 1]} : vector<1x128xf32> to vector<1x32xf32>
    %97 = vector.extract_strided_slice %94 {offsets = [0, 32], sizes = [1, 32], strides = [1, 1]} : vector<1x128xf32> to vector<1x32xf32>
    %98 = vector.extract_strided_slice %95 {offsets = [0, 64], sizes = [1, 32], strides = [1, 1]} : vector<1x128xf32> to vector<1x32xf32>
    %99 = vector.extract_strided_slice %94 {offsets = [0, 96], sizes = [1, 32], strides = [1, 1]} : vector<1x128xf32> to vector<1x32xf32>
    %100 = arith.mulf %97, %84 : vector<1x32xf32>
    %101 = arith.mulf %96, %98 : vector<1x32xf32>
    %102 = arith.addf %100, %101 : vector<1x32xf32>
    %103 = math.tanh %102 : vector<1x32xf32>
    %104 = arith.mulf %99, %103 : vector<1x32xf32>
    %105 = vector.extract_strided_slice %30 {offsets = [4, 0], sizes = [1, 128], strides = [1, 1]} : vector<8x128xf32> to vector<1x128xf32>
    %cst_24 = arith.constant dense<0.000000e+00> : vector<1x128xf32>
    %106 = tpu.matmul %104, %26, %cst_24 {dimension_numbers = #tpu.dot_dimension_numbers<[1], [0], [0], [1], [0, 0, 1, 1], [], []>} : vector<1x32xf32>, vector<32x128xf32>, vector<1x128xf32> -> vector<1x128xf32>
    %107 = arith.addf %105, %106 : vector<1x128xf32>
    %108 = arith.negf %107 : vector<1x128xf32>
    %109 = math.exp %108 : vector<1x128xf32>
    %cst_25 = arith.constant 1.000000e+00 : f32
    %110 = vector.broadcast %cst_25 : f32 to vector<1x128xf32>
    %111 = arith.addf %110, %109 : vector<1x128xf32>
    %112 = arith.divf %110, %111 : vector<1x128xf32>
    %113 = math.tanh %107 : vector<1x128xf32>
    %114 = vector.extract_strided_slice %112 {offsets = [0, 0], sizes = [1, 32], strides = [1, 1]} : vector<1x128xf32> to vector<1x32xf32>
    %115 = vector.extract_strided_slice %112 {offsets = [0, 32], sizes = [1, 32], strides = [1, 1]} : vector<1x128xf32> to vector<1x32xf32>
    %116 = vector.extract_strided_slice %113 {offsets = [0, 64], sizes = [1, 32], strides = [1, 1]} : vector<1x128xf32> to vector<1x32xf32>
    %117 = vector.extract_strided_slice %112 {offsets = [0, 96], sizes = [1, 32], strides = [1, 1]} : vector<1x128xf32> to vector<1x32xf32>
    %118 = arith.mulf %115, %102 : vector<1x32xf32>
    %119 = arith.mulf %114, %116 : vector<1x32xf32>
    %120 = arith.addf %118, %119 : vector<1x32xf32>
    %121 = math.tanh %120 : vector<1x32xf32>
    %122 = arith.mulf %117, %121 : vector<1x32xf32>
    %123 = vector.extract_strided_slice %30 {offsets = [5, 0], sizes = [1, 128], strides = [1, 1]} : vector<8x128xf32> to vector<1x128xf32>
    %cst_26 = arith.constant dense<0.000000e+00> : vector<1x128xf32>
    %124 = tpu.matmul %122, %26, %cst_26 {dimension_numbers = #tpu.dot_dimension_numbers<[1], [0], [0], [1], [0, 0, 1, 1], [], []>} : vector<1x32xf32>, vector<32x128xf32>, vector<1x128xf32> -> vector<1x128xf32>
    %125 = arith.addf %123, %124 : vector<1x128xf32>
    %126 = arith.negf %125 : vector<1x128xf32>
    %127 = math.exp %126 : vector<1x128xf32>
    %cst_27 = arith.constant 1.000000e+00 : f32
    %128 = vector.broadcast %cst_27 : f32 to vector<1x128xf32>
    %129 = arith.addf %128, %127 : vector<1x128xf32>
    %130 = arith.divf %128, %129 : vector<1x128xf32>
    %131 = math.tanh %125 : vector<1x128xf32>
    %132 = vector.extract_strided_slice %130 {offsets = [0, 0], sizes = [1, 32], strides = [1, 1]} : vector<1x128xf32> to vector<1x32xf32>
    %133 = vector.extract_strided_slice %130 {offsets = [0, 32], sizes = [1, 32], strides = [1, 1]} : vector<1x128xf32> to vector<1x32xf32>
    %134 = vector.extract_strided_slice %131 {offsets = [0, 64], sizes = [1, 32], strides = [1, 1]} : vector<1x128xf32> to vector<1x32xf32>
    %135 = vector.extract_strided_slice %130 {offsets = [0, 96], sizes = [1, 32], strides = [1, 1]} : vector<1x128xf32> to vector<1x32xf32>
    %136 = arith.mulf %133, %120 : vector<1x32xf32>
    %137 = arith.mulf %132, %134 : vector<1x32xf32>
    %138 = arith.addf %136, %137 : vector<1x32xf32>
    %139 = math.tanh %138 : vector<1x32xf32>
    %140 = arith.mulf %135, %139 : vector<1x32xf32>
    %141 = vector.extract_strided_slice %30 {offsets = [6, 0], sizes = [1, 128], strides = [1, 1]} : vector<8x128xf32> to vector<1x128xf32>
    %cst_28 = arith.constant dense<0.000000e+00> : vector<1x128xf32>
    %142 = tpu.matmul %140, %26, %cst_28 {dimension_numbers = #tpu.dot_dimension_numbers<[1], [0], [0], [1], [0, 0, 1, 1], [], []>} : vector<1x32xf32>, vector<32x128xf32>, vector<1x128xf32> -> vector<1x128xf32>
    %143 = arith.addf %141, %142 : vector<1x128xf32>
    %144 = arith.negf %143 : vector<1x128xf32>
    %145 = math.exp %144 : vector<1x128xf32>
    %cst_29 = arith.constant 1.000000e+00 : f32
    %146 = vector.broadcast %cst_29 : f32 to vector<1x128xf32>
    %147 = arith.addf %146, %145 : vector<1x128xf32>
    %148 = arith.divf %146, %147 : vector<1x128xf32>
    %149 = math.tanh %143 : vector<1x128xf32>
    %150 = vector.extract_strided_slice %148 {offsets = [0, 0], sizes = [1, 32], strides = [1, 1]} : vector<1x128xf32> to vector<1x32xf32>
    %151 = vector.extract_strided_slice %148 {offsets = [0, 32], sizes = [1, 32], strides = [1, 1]} : vector<1x128xf32> to vector<1x32xf32>
    %152 = vector.extract_strided_slice %149 {offsets = [0, 64], sizes = [1, 32], strides = [1, 1]} : vector<1x128xf32> to vector<1x32xf32>
    %153 = vector.extract_strided_slice %148 {offsets = [0, 96], sizes = [1, 32], strides = [1, 1]} : vector<1x128xf32> to vector<1x32xf32>
    %154 = arith.mulf %151, %138 : vector<1x32xf32>
    %155 = arith.mulf %150, %152 : vector<1x32xf32>
    %156 = arith.addf %154, %155 : vector<1x32xf32>
    %157 = math.tanh %156 : vector<1x32xf32>
    %158 = arith.mulf %153, %157 : vector<1x32xf32>
    %159 = vector.extract_strided_slice %30 {offsets = [7, 0], sizes = [1, 128], strides = [1, 1]} : vector<8x128xf32> to vector<1x128xf32>
    %cst_30 = arith.constant dense<0.000000e+00> : vector<1x128xf32>
    %160 = tpu.matmul %158, %26, %cst_30 {dimension_numbers = #tpu.dot_dimension_numbers<[1], [0], [0], [1], [0, 0, 1, 1], [], []>} : vector<1x32xf32>, vector<32x128xf32>, vector<1x128xf32> -> vector<1x128xf32>
    %161 = arith.addf %159, %160 : vector<1x128xf32>
    %162 = arith.negf %161 : vector<1x128xf32>
    %163 = math.exp %162 : vector<1x128xf32>
    %cst_31 = arith.constant 1.000000e+00 : f32
    %164 = vector.broadcast %cst_31 : f32 to vector<1x128xf32>
    %165 = arith.addf %164, %163 : vector<1x128xf32>
    %166 = arith.divf %164, %165 : vector<1x128xf32>
    %167 = math.tanh %161 : vector<1x128xf32>
    %168 = vector.extract_strided_slice %166 {offsets = [0, 0], sizes = [1, 32], strides = [1, 1]} : vector<1x128xf32> to vector<1x32xf32>
    %169 = vector.extract_strided_slice %166 {offsets = [0, 32], sizes = [1, 32], strides = [1, 1]} : vector<1x128xf32> to vector<1x32xf32>
    %170 = vector.extract_strided_slice %167 {offsets = [0, 64], sizes = [1, 32], strides = [1, 1]} : vector<1x128xf32> to vector<1x32xf32>
    %171 = vector.extract_strided_slice %166 {offsets = [0, 96], sizes = [1, 32], strides = [1, 1]} : vector<1x128xf32> to vector<1x32xf32>
    %172 = arith.mulf %169, %156 : vector<1x32xf32>
    %173 = arith.mulf %168, %170 : vector<1x32xf32>
    %174 = arith.addf %172, %173 : vector<1x32xf32>
    %175 = math.tanh %174 : vector<1x32xf32>
    %176 = arith.mulf %171, %175 : vector<1x32xf32>
    %177 = tpu.concatenate %50, %68, %86, %104, %122, %140, %158, %176 in 0 : vector<1x32xf32>, vector<1x32xf32>, vector<1x32xf32>, vector<1x32xf32>, vector<1x32xf32>, vector<1x32xf32>, vector<1x32xf32>, vector<1x32xf32> -> vector<8x32xf32>
    %c0_32 = arith.constant 0 : index
    %c0_33 = arith.constant 0 : index
    %178 = vector.load %arg5[%c0_32, %c0_33] : memref<8x32xf32, #tpu.memory_space<vmem>>, vector<8x32xf32>
    tpu.vector_store %arg5[%c0_32, %c0_33], %177 {strides = array<i32>} : memref<8x32xf32, #tpu.memory_space<vmem>>, vector<8x32xf32>,
    return
  }
}

</mosaic_0001>

<bundles_post_ra>
// kernel: tpu_custom_call.1
= control target key start
LH: loop header
LB: loop body
LE: loop exit
PB: predicated region body
PF: predicated region fallthrough
CT: control target
= control target key end

     0   :  { %10 = vsyncpa [#allocation4], 0  ;;  %s1626_s0 = inlined_call_operand.vmem [shape: s32[8], index: 0, kind: input, shape index: {}]   ;;  %s1627_s1 = inlined_call_operand.vmem [shape: f32[50,32], index: 1, kind: input, shape index: {}]   ;;  %s1628_s2 = inlined_call_operand.vmem [shape: f32[32,128], index: 2, kind: input, shape index: {}]   ;;  %s1629_s3 = inlined_call_operand.vmem [shape: f32[32,128], index: 3, kind: input, shape index: {}]   ;;  %s1630_s4 = inlined_call_operand.vmem [shape: f32[1,128], index: 4, kind: input, shape index: {}]   ;;  %s1631_s5 = inlined_call_operand.hbm [shape: f32[8,32], index: 5, kind: output, shape index: {}]  }
   0x1   :  { %11 = vsyncpa [#allocation3], 0  ;;  %s18_s20 = sshll.u32 %s1626_s0, 4  ;;  %s19_s20 = int_to_ptr.vmem [resolvable:$true] %s18_s20 }
   0x2   :  { %s1356_s21 = scalar_lea.vmem %s19_s20, 16  ;;  %p1361_p1 = scmp.lt.s32.totalorder %s19_s20, %s19_s20 }
   0x3   :  { %p1357_p0 = scmp.ne.s32.totalorder %s19_s20, %s1356_s21  ;;  %p1362_p2 = scmp.lt.s32.totalorder %s1356_s21, %s1356_s21 }
   0x5   :  { %p1363_p3 = por %p1362_p2, %p1361_p1 }
   0x7   :  { %p1364_p4 = pnand %p1363_p3, %p1357_p0 }
   0x9   :  { %1367 = shalt.err (!%p1364_p4)
}
   0xa   :  { %s1394_s22 = smov [#allocation2]  }
   0xb   :  { %21 = dma.vmem_to_smem %s19_s20, 16, %s1394_s22, [#allocation4]  }
   0xc   :  { %1390 = dma.done.wait [#allocation4], 16  }
   0xd   :  { %1391 = vsyncadd [#allocation4], 4294967280 }
   0xe   :  { %33 = sfence }
   0xf   :  { %v93_v0 = vld [vmem:[%s1628_s2] sm:$0xff]  ;;  %v94_v1 = vld [vmem:[%s1628_s2 + $0x8] sm:$0xff]  ;;  %v1395_v3 = vmov 0.0|0.0   ;;  %v95_v6 = vld [vmem:[%s1628_s2 + $0x10] sm:$0xff]  ;;  %s1454_s9 = sld [smem:[#allocation2]]  ;;  %vm1396_vm0 = vmmov 0  }
  0x10   :  { %v97_v2 = vld [vmem:[%s1629_s3] sm:$0xff]  ;;  %1231 = vmatprep.subr.bf16.mxu0 %v1395_v3  ;;  %v1232_v4 = vpack.c.bf16 %v94_v1, %v93_v0  ;;  %1237 = vmatprep.subr.bf16.mxu1 %v1395_v3  ;;  %v98_v5 = vld [vmem:[%s1629_s3 + $0x8] sm:$0xff]  ;;  %v96_v7 = vld [vmem:[%s1628_s2 + $0x18] sm:$0xff]  ;;  %v1397_v11 = vmov 0.0   ;;  %s1063_s14 = sld [smem:[#allocation2 + $0x1]]  ;;  %s1064_s2 = sld [smem:[#allocation2 + $0x2]] }
  0x11   :  { %v1456_v8 = vpack.c.bf16 %v98_v5, %v97_v2  ;;  %v99_v9 = vld [vmem:[%s1629_s3 + $0x10] sm:$0xff]  ;;  %v100_v10 = vld [vmem:[%s1629_s3 + $0x18] sm:$0xff]  ;;  %1140 = vmatprep.mubr.msk.f32.mxu0 %vm1396_vm0, %v1397_v11  ;;  %1151 = vmatprep.mubr.msk.f32.mxu1 %vm1396_vm0, %v1397_v11  ;;  %v1235_v12 = vpack.c.bf16 %v96_v7, %v95_v6  ;;  %s1065_s15 = sld [smem:[#allocation2 + $0x3]]  ;;  %s1066_s16 = sld [smem:[#allocation2 + $0x4]]  ;;  %vm79_vm1 = vcmask 1040384   ;;  %vm81_vm2 = vcmask 1041408  }
  0x12   :  { %1233 = vmatpush3.bf16.msra.mxu0 %v1232_v4  ;;  %v1470_v13 = vpack.c.bf16 %v100_v10, %v99_v9  ;;  %s1067_s3 = sld [smem:[#allocation2 + $0x5]]  ;;  %s1068_s17 = sld [smem:[#allocation2 + $0x6]]  ;;  %vm83_vm3 = vcmask 1042432   ;;  %vm85_vm4 = vcmask 1043456   ;;  %vm87_vm5 = vcmask 1044480  }
  0x13   :  { %1239 = vmatpush3.bf16.msra.mxu1 %v1456_v8  ;;  %1234 = vmatprep.subr.bf16.mxu0 %v1395_v3  ;;  %s1069_s18 = sld [smem:[#allocation2 + $0x7]]  ;;  %vm89_vm6 = vcmask 1045504   ;;  %vm91_vm7 = vcmask 1046528   ;;  %vm108_vm8 = vcmask 261120   ;;  %v1070_v38 = vld [vmem:[%s1630_s4] ss:$0 sm:$0xff] }
  0x14   :  { %1240 = vmatprep.subr.bf16.mxu1 %v1395_v3  ;;  %s1399_s4 = smov 32  }
  0x15   :  { %s35_s21 = scalar_lea.vmem %s1627_s1, %s1454_s9 }
  0x16   :  { %1236 = vmatpush3.bf16.msra.mxu0 %v1235_v12  ;;  %s38_s24 = scalar_lea.vmem %s1627_s1, %s1063_s14  ;;  %s41_s0 = scalar_lea.vmem %s1627_s1, %s1064_s2  ;;  %v36_v14 = vld [vmem:[%s35_s21] sm:$0x1] }
  0x17   :  { %1242 = vmatpush3.bf16.msra.mxu1 %v1470_v13  ;;  %1243 = vmatprep.subr.bf16.mxu0 %v1395_v3  ;;  %v39_v15 = vld [vmem:[%s38_s24] sm:$0x1]  ;;  %s44_s29 = scalar_lea.vmem %s1627_s1, %s1065_s15  ;;  %s47_s7 = scalar_lea.vmem %s1627_s1, %s1066_s16 }
  0x18   :  { %v42_v16 = vld [vmem:[%s41_s0] sm:$0x1]  ;;  %1249 = vmatprep.subr.bf16.mxu1 %v1395_v3  ;;  %s50_s10 = scalar_lea.vmem %s1627_s1, %s1067_s3  ;;  %s53_s13 = scalar_lea.vmem %s1627_s1, %s1068_s17  ;;  %v59_v19 = vrot.slane %v39_v15, 7 }
  0x19   :  { %v45_v17 = vld [vmem:[%s44_s29] sm:$0x1]  ;;  %v62_v20 = vrot.slane %v42_v16, 6  ;;  %s56_s15 = scalar_lea.vmem %s1627_s1, %s1069_s18  ;;  %s1398_s3 = smov 64  }
  0x1a   :  { %v48_v18 = vld [vmem:[%s47_s7] sm:$0x1]  ;;  %v65_v23 = vrot.slane %v45_v17, 5  ;;  %1152 = vmatmul.mubr.f32.vlgmr.msra.gmra.mrb[0].mxu1 %v1397_v11  ;;  %v80_v27 = vsel %vm79_vm1, %v36_v14, %v59_v19  ;;  %s1400_s17 = smov [#allocation5]  }
  0x1b   :  { %v51_v21 = vld [vmem:[%s50_s10] sm:$0x1]  ;;  %v68_v24 = vrot.slane %v48_v18, 4  ;;  %1251 = vmatpush3.bf16.msra.mxu1 %v1456_v8  ;;  %1173 = vmatprep.mubr.msk.f32.mxu1 %vm1396_vm0, %v1397_v11  ;;  %v82_v29 = vsel %vm81_vm2, %v80_v27, %v62_v20  ;;  %s1046_s18 = sshll.u32 %s1400_s17, 4  ;;  %s1047_s18 = int_to_ptr.vmem [resolvable:$true] %s1046_s18 }
  0x1c   :  { %v54_v22 = vld [vmem:[%s53_s13] sm:$0x1]  ;;  %v71_v26 = vrot.slane %v51_v21, 3  ;;  %1252 = vmatprep.subr.bf16.mxu1 %v1395_v3  ;;  %v84_v31 = vsel %vm83_vm3, %v82_v29, %v65_v23  ;;  %s1368_s19 = scalar_lea.vmem %s1047_s18, 128  ;;  %p1373_p6 = scmp.lt.s32.totalorder %s1047_s18, %s1047_s18 }
  0x1d   :  { %v57_v25 = vld [vmem:[%s56_s15] sm:$0x1]  ;;  %v74_v28 = vrot.slane %v54_v22, 2  ;;  %v86_v32 = vsel %vm85_vm4, %v84_v31, %v68_v24  ;;  %p1369_p5 = scmp.ne.s32.totalorder %s1047_s18, %s1368_s19  ;;  %p1374_p7 = scmp.lt.s32.totalorder %s1368_s19, %s1368_s19 }
  0x1e   :  { %v77_v30 = vrot.slane %v57_v25, 1  ;;  %v88_v33 = vsel %vm87_vm5, %v86_v32, %v71_v26 }
  0x1f   :  { %1254 = vmatpush3.bf16.msra.mxu1 %v1470_v13  ;;  %v90_v34 = vsel %vm89_vm6, %v88_v33, %v74_v28  ;;  %p1375_p8 = por %p1374_p7, %p1373_p6 }
  0x20   :  { %1261 = vmatprep.subr.bf16.mxu1 %v1395_v3  ;;  %v92_v35 = vsel %vm91_vm7, %v90_v34, %v77_v30 }
  0x21   :  { %1141 = vmatmul.mubr.msk.f32.vlgmr.msra.gmra.mrb[0].mxu0 %vm108_vm8, %v92_v35  ;;  %p1376_p9 = pnand %p1375_p8, %p1369_p5 }
  0x22   :  { %1245 = vmatpush3.bf16.msra.mxu0 %v1456_v8  ;;  %1162 = vmatprep.mubr.msk.f32.mxu0 %vm1396_vm0, %v1397_v11 }
  0x23   :  { %1246 = vmatprep.subr.bf16.mxu0 %v1395_v3 }
  0x26   :  { %1248 = vmatpush3.bf16.msra.mxu0 %v1470_v13 }
  0x27   :  { %1255 = vmatprep.subr.bf16.mxu0 %v1395_v3 }
  0xed   :  { %v251_v36 = vpop.f32.mrb[0].mxu1 }
  0xee   :  { %v1153_v37 = vpop.f32.mrb[1].mxu1 }
  0xf4   :  { %v178_v39 = vpop.f32.mrb[0].mxu0 }
  0xf5   :  { %v1525_v40 = vadd.f32 %v1070_v38, %v178_v39  ;;  %v1142_v41 = vpop.f32.mrb[1].mxu0 }
  0xf7   :  { %v255_v42 = vadd.f32 %v251_v36, %v1525_v40 }
  0xf9   :  { %1292 = vtanh.f32 %v255_v42  ;;  %v1072_v44 = vmul.f32 -1.442695, %v255_v42 }
  0xfb   :  { %1294 = vpow2.f32 %v1072_v44 }
 0x103   :  { %v1293_v43 = vpop.eup %1292 }
 0x104   :  { %265 = vrot.lane.b32.xlu0 %v1293_v43, %s1398_s3 }
 0x105   :  { %v1295_v45 = vpop.eup %1294 }
 0x106   :  { %v259_v46 = vadd.f32 1.0, %v1295_v45 }
 0x108   :  { %1296 = vrcp.f32 %v259_v46 }
 0x112   :  { %v1297_v47 = vpop.eup %1296 }
 0x113   :  { %v263_v50 = vmul.f32 0.0, %v1297_v47 }
 0x176   :  { %v266_v48 = vpop.permute.xlu0 %265 }
 0x177   :  { %v268_v49 = vmul.f32 %v1297_v47, %v266_v48 }
 0x179   :  { %270 = vrot.lane.b32.xlu0 %v268_v49, %s1399_s4 }
 0x1eb   :  { %v271_v51 = vpop.permute.xlu0 %270 }
 0x1ec   :  { %v273_v52 = vadd.f32 %v271_v51, %v263_v50 }
 0x1ee   :  { %1298 = vtanh.f32 %v273_v52  ;;  %v367_v5 = vrot.slane %v273_v52, 7 }
 0x1f8   :  { %v1299_v53 = vpop.eup %1298 }
 0x1f9   :  { %276 = vrot.lane.b32.xlu1 %v1299_v53, %s1398_s3 }
 0x26b   :  { %v277_v54 = vpop.permute.xlu1 %276 }
 0x26c   :  { %v1531_v55 = vmul.f32 %v1297_v47, %v277_v54 }
 0x26e   :  { %281 = vrot.lane.b32.xlu1 %v1531_v55, %s1399_s4 }
 0x2e0   :  { %v282_v56 = vpop.permute.xlu1 %281 }
 0x2e1   :  { %1163 = vmatmul.mubr.msk.f32.vlgmr.msra.gmra.mrb[2].mxu0 %vm108_vm8, %v282_v56 }
 0x2e2   :  { %1257 = vmatpush3.bf16.msra.mxu0 %v1456_v8  ;;  %1184 = vmatprep.mubr.msk.f32.mxu0 %vm1396_vm0, %v1397_v11 }
 0x2e3   :  { %1258 = vmatprep.subr.bf16.mxu0 %v1395_v3 }
 0x2e6   :  { %1260 = vmatpush3.bf16.msra.mxu0 %v1470_v13 }
 0x2e7   :  { %1267 = vmatprep.subr.bf16.mxu0 %v1395_v3 }
 0x3b4   :  { %v351_v57 = vpop.f32.mrb[2].mxu0 }
 0x3b5   :  { %v356_v58 = vrot.slane %v351_v57, 7  ;;  %v1164_v59 = vpop.f32.mrb[3].mxu0 }
 0x3b7   :  { %v358_v60 = vadd.f32 %v356_v58, %v1525_v40 }
 0x3b9   :  { %1300 = vtanh.f32 %v358_v60  ;;  %v1074_v62 = vmul.f32 -1.442695, %v358_v60 }
 0x3bb   :  { %1302 = vpow2.f32 %v1074_v62 }
 0x3c3   :  { %v1301_v61 = vpop.eup %1300 }
 0x3c4   :  { %371 = vrot.lane.b32.xlu0 %v1301_v61, %s1398_s3 }
 0x3c5   :  { %v1303_v63 = vpop.eup %1302 }
 0x3c6   :  { %v362_v0 = vadd.f32 1.0, %v1303_v63 }
 0x3c8   :  { %1304 = vrcp.f32 %v362_v0 }
 0x3d2   :  { %v1305_v1 = vpop.eup %1304 }
 0x3d3   :  { %v369_v6 = vmul.f32 %v1305_v1, %v367_v5 }
 0x436   :  { %v372_v2 = vpop.permute.xlu0 %371 }
 0x437   :  { %v374_v4 = vmul.f32 %v1305_v1, %v372_v2 }
 0x439   :  { %376 = vrot.lane.b32.xlu1 %v374_v4, %s1399_s4 }
 0x4ab   :  { %v377_v7 = vpop.permute.xlu1 %376 }
 0x4ac   :  { %v379_v9 = vadd.f32 %v377_v7, %v369_v6 }
 0x4ae   :  { %1306 = vtanh.f32 %v379_v9  ;;  %v474_v28 = vrot.slane %v379_v9, 7 }
 0x4b8   :  { %v1307_v10 = vpop.eup %1306 }
 0x4b9   :  { %382 = vrot.lane.b32.xlu0 %v1307_v10, %s1398_s3 }
 0x52b   :  { %v383_v12 = vpop.permute.xlu0 %382 }
 0x52c   :  { %v385_v14 = vmul.f32 %v1305_v1, %v383_v12 }
 0x52e   :  { %v387_v15 = vrot.slane %v385_v14, 1  ;;  %v1028_v35 = vsel %vm79_vm1, %v1531_v55, %v385_v14 }
 0x530   :  { %388 = vrot.lane.b32.xlu1 %v387_v15, %s1399_s4 }
 0x5a2   :  { %v389_v16 = vpop.permute.xlu1 %388 }
 0x5a3   :  { %1174 = vmatmul.mubr.msk.f32.vlgmr.msra.gmra.mrb[2].mxu1 %vm108_vm8, %v389_v16 }
 0x5a4   :  { %1263 = vmatpush3.bf16.msra.mxu1 %v1456_v8  ;;  %1195 = vmatprep.mubr.msk.f32.mxu1 %vm1396_vm0, %v1397_v11 }
 0x5a5   :  { %1264 = vmatprep.subr.bf16.mxu1 %v1395_v3 }
 0x5a8   :  { %1266 = vmatpush3.bf16.msra.mxu1 %v1470_v13 }
 0x5a9   :  { %1273 = vmatprep.subr.bf16.mxu1 %v1395_v3 }
 0x676   :  { %v458_v17 = vpop.f32.mrb[2].mxu1 }
 0x677   :  { %v463_v18 = vrot.slane %v458_v17, 6  ;;  %v1175_v19 = vpop.f32.mrb[3].mxu1 }
 0x679   :  { %v465_v20 = vadd.f32 %v463_v18, %v1525_v40 }
 0x67b   :  { %1308 = vtanh.f32 %v465_v20  ;;  %v1076_v22 = vmul.f32 -1.442695, %v465_v20 }
 0x67d   :  { %1310 = vpow2.f32 %v1076_v22 }
 0x685   :  { %v1309_v21 = vpop.eup %1308 }
 0x686   :  { %478 = vrot.lane.b32.xlu0 %v1309_v21, %s1398_s3 }
 0x687   :  { %v1311_v23 = vpop.eup %1310 }
 0x688   :  { %v469_v24 = vadd.f32 1.0, %v1311_v23 }
 0x68a   :  { %1312 = vrcp.f32 %v469_v24 }
 0x694   :  { %v1313_v25 = vpop.eup %1312 }
 0x695   :  { %v476_v29 = vmul.f32 %v1313_v25, %v474_v28 }
 0x6f8   :  { %v479_v26 = vpop.permute.xlu0 %478 }
 0x6f9   :  { %v481_v27 = vmul.f32 %v1313_v25, %v479_v26 }
 0x6fb   :  { %483 = vrot.lane.b32.xlu1 %v481_v27, %s1399_s4 }
 0x76d   :  { %v484_v30 = vpop.permute.xlu1 %483 }
 0x76e   :  { %v486_v31 = vadd.f32 %v484_v30, %v476_v29 }
 0x770   :  { %1314 = vtanh.f32 %v486_v31  ;;  %v581_v51 = vrot.slane %v486_v31, 7 }
 0x77a   :  { %v1315_v32 = vpop.eup %1314 }
 0x77b   :  { %489 = vrot.lane.b32.xlu0 %v1315_v32, %s1398_s3 }
 0x7ed   :  { %v490_v33 = vpop.permute.xlu0 %489 }
 0x7ee   :  { %v492_v34 = vmul.f32 %v1313_v25, %v490_v33 }
 0x7f0   :  { %v494_v36 = vrot.slane %v492_v34, 2  ;;  %v1029_v37 = vsel %vm81_vm2, %v1028_v35, %v492_v34 }
 0x7f2   :  { %495 = vrot.lane.b32.xlu1 %v494_v36, %s1399_s4 }
 0x864   :  { %v496_v38 = vpop.permute.xlu1 %495 }
 0x865   :  { %1185 = vmatmul.mubr.msk.f32.vlgmr.msra.gmra.mrb[4].mxu0 %vm108_vm8, %v496_v38 }
 0x866   :  { %1269 = vmatpush3.bf16.msra.mxu0 %v1456_v8  ;;  %1206 = vmatprep.mubr.msk.f32.mxu0 %vm1396_vm0, %v1397_v11 }
 0x867   :  { %1270 = vmatprep.subr.bf16.mxu0 %v1395_v3 }
 0x86a   :  { %1272 = vmatpush3.bf16.msra.mxu0 %v1470_v13 }
 0x86b   :  { %1279 = vmatprep.subr.bf16.mxu0 %v1395_v3 }
 0x938   :  { %v565_v39 = vpop.f32.mrb[4].mxu0 }
 0x939   :  { %v570_v41 = vrot.slane %v565_v39, 5  ;;  %v1186_v42 = vpop.f32.mrb[5].mxu0 }
 0x93b   :  { %v572_v43 = vadd.f32 %v570_v41, %v1525_v40 }
 0x93d   :  { %1316 = vtanh.f32 %v572_v43  ;;  %v1078_v45 = vmul.f32 -1.442695, %v572_v43 }
 0x93f   :  { %1318 = vpow2.f32 %v1078_v45 }
 0x947   :  { %v1317_v44 = vpop.eup %1316 }
 0x948   :  { %585 = vrot.lane.b32.xlu0 %v1317_v44, %s1398_s3 }
 0x949   :  { %v1319_v46 = vpop.eup %1318 }
 0x94a   :  { %v576_v47 = vadd.f32 1.0, %v1319_v46 }
 0x94c   :  { %1320 = vrcp.f32 %v576_v47 }
 0x956   :  { %v1321_v48 = vpop.eup %1320 }
 0x957   :  { %v583_v52 = vmul.f32 %v1321_v48, %v581_v51 }
 0x9ba   :  { %v586_v49 = vpop.permute.xlu0 %585 }
 0x9bb   :  { %v588_v50 = vmul.f32 %v1321_v48, %v586_v49 }
 0x9bd   :  { %590 = vrot.lane.b32.xlu1 %v588_v50, %s1399_s4 }
 0xa2f   :  { %v591_v53 = vpop.permute.xlu1 %590 }
 0xa30   :  { %v593_v54 = vadd.f32 %v591_v53, %v583_v52 }
 0xa32   :  { %1322 = vtanh.f32 %v593_v54  ;;  %v688_v10 = vrot.slane %v593_v54, 7 }
 0xa3c   :  { %v1323_v55 = vpop.eup %1322 }
 0xa3d   :  { %596 = vrot.lane.b32.xlu0 %v1323_v55, %s1398_s3 }
 0xaaf   :  { %v597_v56 = vpop.permute.xlu0 %596 }
 0xab0   :  { %v599_v57 = vmul.f32 %v1321_v48, %v597_v56 }
 0xab2   :  { %v601_v58 = vrot.slane %v599_v57, 3  ;;  %v1030_v59 = vsel %vm83_vm3, %v1029_v37, %v599_v57 }
 0xab4   :  { %602 = vrot.lane.b32.xlu1 %v601_v58, %s1399_s4 }
 0xb26   :  { %v603_v60 = vpop.permute.xlu1 %602 }
 0xb27   :  { %1196 = vmatmul.mubr.msk.f32.vlgmr.msra.gmra.mrb[4].mxu1 %vm108_vm8, %v603_v60 }
 0xb28   :  { %1275 = vmatpush3.bf16.msra.mxu1 %v1456_v8  ;;  %1217 = vmatprep.mubr.msk.f32.mxu1 %vm1396_vm0, %v1397_v11 }
 0xb29   :  { %1276 = vmatprep.subr.bf16.mxu1 %v1395_v3 }
 0xb2c   :  { %1278 = vmatpush3.bf16.msra.mxu1 %v1470_v13 }
 0xbfa   :  { %v672_v61 = vpop.f32.mrb[4].mxu1 }
 0xbfb   :  { %v677_v62 = vrot.slane %v672_v61, 4  ;;  %v1197_v63 = vpop.f32.mrb[5].mxu1 }
 0xbfd   :  { %v679_v0 = vadd.f32 %v677_v62, %v1525_v40 }
 0xbff   :  { %1324 = vtanh.f32 %v679_v0  ;;  %v1080_v2 = vmul.f32 -1.442695, %v679_v0 }
 0xc01   :  { %1326 = vpow2.f32 %v1080_v2 }
 0xc09   :  { %v1325_v1 = vpop.eup %1324 }
 0xc0a   :  { %692 = vrot.lane.b32.xlu0 %v1325_v1, %s1398_s3 }
 0xc0b   :  { %v1327_v4 = vpop.eup %1326 }
 0xc0c   :  { %v683_v5 = vadd.f32 1.0, %v1327_v4 }
 0xc0e   :  { %1328 = vrcp.f32 %v683_v5 }
 0xc18   :  { %v1329_v6 = vpop.eup %1328 }
 0xc19   :  { %v690_v12 = vmul.f32 %v1329_v6, %v688_v10 }
 0xc7c   :  { %v693_v7 = vpop.permute.xlu0 %692 }
 0xc7d   :  { %v695_v9 = vmul.f32 %v1329_v6, %v693_v7 }
 0xc7f   :  { %697 = vrot.lane.b32.xlu1 %v695_v9, %s1399_s4 }
 0xcf1   :  { %v698_v14 = vpop.permute.xlu1 %697 }
 0xcf2   :  { %v700_v15 = vadd.f32 %v698_v14, %v690_v12 }
 0xcf4   :  { %1330 = vtanh.f32 %v700_v15 }
 0xcfe   :  { %v1331_v16 = vpop.eup %1330 }
 0xcff   :  { %703 = vrot.lane.b32.xlu0 %v1331_v16, %s1398_s3 }
 0xd71   :  { %v704_v17 = vpop.permute.xlu0 %703 }
 0xd72   :  { %v706_v18 = vmul.f32 %v1329_v6, %v704_v17 }
 0xd74   :  { %v708_v19 = vrot.slane %v706_v18, 4  ;;  %v1031_v20 = vsel %vm85_vm4, %v1030_v59, %v706_v18 }
 0xd76   :  { %709 = vrot.lane.b32.xlu1 %v708_v19, %s1399_s4 }
 0xde8   :  { %v710_v21 = vpop.permute.xlu1 %709 }
 0xde9   :  { %1207 = vmatmul.mubr.msk.f32.vlgmr.msra.gmra.mrb[6].mxu0 %vm108_vm8, %v710_v21 }
 0xdea   :  { %1281 = vmatpush3.bf16.msra.mxu0 %v1456_v8  ;;  %1228 = vmatprep.mubr.msk.f32.mxu0 %vm1396_vm0, %v1397_v11 }
 0xdeb   :  { %1282 = vmatprep.subr.bf16.mxu0 %v1395_v3  ;;  %v795_v3 = vrot.slane %v700_v15, 7 }
 0xdee   :  { %1284 = vmatpush3.bf16.msra.mxu0 %v1470_v13 }
 0xebc   :  { %v779_v22 = vpop.f32.mrb[6].mxu0 }
 0xebd   :  { %v784_v23 = vrot.slane %v779_v22, 3  ;;  %v1208_v24 = vpop.f32.mrb[7].mxu0 }
 0xebf   :  { %v786_v25 = vadd.f32 %v784_v23, %v1525_v40 }
 0xec1   :  { %1332 = vtanh.f32 %v786_v25  ;;  %v1082_v27 = vmul.f32 -1.442695, %v786_v25 }
 0xec3   :  { %1334 = vpow2.f32 %v1082_v27 }
 0xecb   :  { %v1333_v26 = vpop.eup %1332 }
 0xecc   :  { %799 = vrot.lane.b32.xlu0 %v1333_v26, %s1398_s3 }
 0xecd   :  { %v1335_v28 = vpop.eup %1334 }
 0xece   :  { %v790_v8 = vadd.f32 1.0, %v1335_v28 }
 0xed0   :  { %1336 = vrcp.f32 %v790_v8 }
 0xeda   :  { %v1337_v29 = vpop.eup %1336 }
 0xedb   :  { %v797_v13 = vmul.f32 %v1337_v29, %v795_v3 }
 0xf3e   :  { %v800_v11 = vpop.permute.xlu0 %799 }
 0xf3f   :  { %v802_v30 = vmul.f32 %v1337_v29, %v800_v11 }
 0xf41   :  { %804 = vrot.lane.b32.xlu1 %v802_v30, %s1399_s4 }
 0xfb3   :  { %v805_v31 = vpop.permute.xlu1 %804 }
 0xfb4   :  { %v807_v32 = vadd.f32 %v805_v31, %v797_v13 }
 0xfb6   :  { %1338 = vtanh.f32 %v807_v32  ;;  %v902_v51 = vrot.slane %v807_v32, 7 }
 0xfc0   :  { %v1339_v33 = vpop.eup %1338 }
 0xfc1   :  { %810 = vrot.lane.b32.xlu0 %v1339_v33, %s1398_s3 }
0x1033   :  { %v811_v34 = vpop.permute.xlu0 %810 }
0x1034   :  { %v813_v35 = vmul.f32 %v1337_v29, %v811_v34 }
0x1036   :  { %v815_v36 = vrot.slane %v813_v35, 5  ;;  %v1032_v37 = vsel %vm87_vm5, %v1031_v20, %v813_v35 }
0x1038   :  { %816 = vrot.lane.b32.xlu1 %v815_v36, %s1399_s4 }
0x10aa   :  { %v817_v38 = vpop.permute.xlu1 %816 }
0x10ab   :  { %1218 = vmatmul.mubr.msk.f32.vlgmr.msra.gmra.mrb[6].mxu1 %vm108_vm8, %v817_v38 }
0x117e   :  { %v886_v39 = vpop.f32.mrb[6].mxu1 }
0x117f   :  { %v891_v41 = vrot.slane %v886_v39, 2  ;;  %v1219_v42 = vpop.f32.mrb[7].mxu1 }
0x1181   :  { %v893_v43 = vadd.f32 %v891_v41, %v1525_v40 }
0x1183   :  { %1340 = vtanh.f32 %v893_v43  ;;  %v1084_v45 = vmul.f32 -1.442695, %v893_v43 }
0x1185   :  { %1342 = vpow2.f32 %v1084_v45 }
0x118d   :  { %v1341_v44 = vpop.eup %1340 }
0x118e   :  { %906 = vrot.lane.b32.xlu0 %v1341_v44, %s1398_s3 }
0x118f   :  { %v1343_v46 = vpop.eup %1342 }
0x1190   :  { %v897_v47 = vadd.f32 1.0, %v1343_v46 }
0x1192   :  { %1344 = vrcp.f32 %v897_v47 }
0x119c   :  { %v1345_v48 = vpop.eup %1344 }
0x119d   :  { %v904_v52 = vmul.f32 %v1345_v48, %v902_v51 }
0x1200   :  { %v907_v49 = vpop.permute.xlu0 %906 }
0x1201   :  { %v909_v50 = vmul.f32 %v1345_v48, %v907_v49 }
0x1203   :  { %911 = vrot.lane.b32.xlu1 %v909_v50, %s1399_s4 }
0x1275   :  { %v912_v53 = vpop.permute.xlu1 %911 }
0x1276   :  { %v914_v54 = vadd.f32 %v912_v53, %v904_v52 }
0x1278   :  { %1346 = vtanh.f32 %v914_v54  ;;  %v1009_v10 = vrot.slane %v914_v54, 7 }
0x1282   :  { %v1347_v55 = vpop.eup %1346 }
0x1283   :  { %917 = vrot.lane.b32.xlu0 %v1347_v55, %s1398_s3 }
0x12f5   :  { %v918_v56 = vpop.permute.xlu0 %917 }
0x12f6   :  { %v920_v57 = vmul.f32 %v1345_v48, %v918_v56 }
0x12f8   :  { %v922_v58 = vrot.slane %v920_v57, 6  ;;  %v1033_v59 = vsel %vm89_vm6, %v1032_v37, %v920_v57 }
0x12fa   :  { %923 = vrot.lane.b32.xlu1 %v922_v58, %s1399_s4 }
0x136c   :  { %v924_v60 = vpop.permute.xlu1 %923 }
0x136d   :  { %1229 = vmatmul.mubr.msk.f32.vlgmr.msra.gmra.mrb[8].mxu0 %vm108_vm8, %v924_v60 }
0x1440   :  { %v993_v61 = vpop.f32.mrb[8].mxu0 }
0x1441   :  { %v998_v62 = vrot.slane %v993_v61, 1  ;;  %v1230_v63 = vpop.f32.mrb[9].mxu0 }
0x1443   :  { %v1000_v0 = vadd.f32 %v998_v62, %v1525_v40 }
0x1445   :  { %1348 = vtanh.f32 %v1000_v0  ;;  %v1086_v2 = vmul.f32 -1.442695, %v1000_v0 }
0x1447   :  { %1350 = vpow2.f32 %v1086_v2 }
0x144f   :  { %v1349_v1 = vpop.eup %1348 }
0x1450   :  { %1013 = vrot.lane.b32.xlu0 %v1349_v1, %s1398_s3 }
0x1451   :  { %v1351_v4 = vpop.eup %1350 }
0x1452   :  { %v1004_v5 = vadd.f32 1.0, %v1351_v4 }
0x1454   :  { %1352 = vrcp.f32 %v1004_v5 }
0x145e   :  { %v1353_v6 = vpop.eup %1352 }
0x145f   :  { %v1011_v12 = vmul.f32 %v1353_v6, %v1009_v10 }
0x14c2   :  { %v1014_v7 = vpop.permute.xlu0 %1013 }
0x14c3   :  { %v1016_v9 = vmul.f32 %v1353_v6, %v1014_v7 }
0x14c5   :  { %1018 = vrot.lane.b32.xlu1 %v1016_v9, %s1399_s4 }
0x1537   :  { %v1019_v14 = vpop.permute.xlu1 %1018 }
0x1538   :  { %v1021_v15 = vadd.f32 %v1019_v14, %v1011_v12 }
0x153a   :  { %1354 = vtanh.f32 %v1021_v15 }
0x1544   :  { %v1355_v40 = vpop.eup %1354 }
0x1545   :  { %1024 = vrot.lane.b32.xlu0 %v1355_v40, %s1398_s3 }
0x15b7   :  { %v1025_v16 = vpop.permute.xlu0 %1024 }
0x15b8   :  { %v1027_v17 = vmul.f32 %v1353_v6, %v1025_v16 }
0x15ba   :  { %v1034_v18 = vsel %vm91_vm7, %v1033_v59, %v1027_v17 }
0x15bb   :  { %1036 = vrot.lane.b32.xlu1 %v1034_v18, %s1399_s4 }
0x162d   :  { %v1037_v19 = vpop.permute.xlu1 %1036 }
0x162e   :  { %1039 = vst.msk [vmem:[#allocation5] sm:$0xff] %vm108_vm8, %v1037_v19 }
0x162f   :  { %1379 = shalt.err (!%p1376_p9)
}
0x1630   :  { %s1380_s22 = scalar_lea.hbm %s1631_s5, 128 }
0x1631   :  { %p1381_p10 = scmp.ne.s32.totalorder %s1631_s5, %s1380_s22  ;;  %p1384_p11 = scmp.lt.u32.totalorder %s1380_s22, %s1631_s5 }
0x1633   :  { %p1386_p12 = pnand %p1384_p11, %p1381_p10 }
0x1635   :  { %1389 = shalt.err (!%p1386_p12)
}
0x1636   :  { %1049 = dma.vmem_to_hbm [thread:$0]  %s1047_s18, 128, %s1631_s5, [#allocation3]  }
0x1637   :  { %1392 = dma.done.wait [#allocation3], 128  }
0x1638   :  { %1393 = vsyncadd [#allocation3], 4294967168 }
0x1639   :  { %1053 = vsyncpa [#allocation3], 1 }
0x163a   :  { %1054 = vsyncpa [#allocation4], 1 }

</bundles_post_ra>
